<compile_context>
chip_gen: v6e
topology: v6e:2x2x1
jax: 0.10.0
libtpu: 0.0.40
codegen_flags: <defaults>
</compile_context>

<pallas_src>
import math

import jax
import jax.numpy as jnp
from jax.experimental import pallas as pl
from jax.experimental.pallas import tpu as pltpu


# ----------------------------- tiling constants -----------------------------

_LANE = 128
_TILE_ROWS = 4096                 # 4096 x 128 x 4 B = 2 MiB per f32 block
_MIN_GRID_STEPS = 4               # >= 2 blocks per TensorCore on v7x (2 TCs)
_VMEM_LIMIT = 40 * 1024 * 1024    # fused 2-in/2-out, double-buffered 2 MiB
                                  # blocks ~= 16 MiB resident; raise above
                                  # v5e's 16 MiB default, stay < v7x 64 MiB.
_PALLAS_MIN_ELEMS = 64 * 1024     # < ~256 KiB f32: launch overhead dominates
_BCAST_BLOCK_BYTES = 2 * 1024 * 1024
_BCAST_MAX_U_ELEMS = 64 * 1024    # resident-u path only if u fits easily


def _min_sublane(dtype) -> int:
    return {4: 8, 2: 16, 1: 32}.get(jnp.dtype(dtype).itemsize, 8)


def _compiler_params():
    return pltpu.CompilerParams(dimension_semantics=("parallel",),
                                vmem_limit_bytes=_VMEM_LIMIT)


def _pick_row_tile(rows: int, sub: int) -> int:
    """Biggest tile <= _TILE_ROWS, but keep >= _MIN_GRID_STEPS grid steps."""
    tile = min(_TILE_ROWS, rows)
    if rows > _MIN_GRID_STEPS * sub:
        tile = min(tile, -(-rows // _MIN_GRID_STEPS))
    tile = max(sub, (tile // sub) * sub)
    return tile


# ----------------------------- Pallas kernels -------------------------------

def _rate_kernel(u_ref, rate_ref):
    # rate = exp(u); compute in f32 (v5e EUP has no bf16 path).
    rate_ref[...] = jnp.exp(u_ref[...].astype(jnp.float32)).astype(rate_ref.dtype)


def _log_prob_kernel(u_ref, x_ref, lp_ref):
    # log_prob(x) = log(rate) - rate*x = u - exp(u)*x  (no log, one exp).
    u = u_ref[...].astype(jnp.float32)
    x = x_ref[...].astype(jnp.float32)
    lp_ref[...] = (u - jnp.exp(u) * x).astype(lp_ref.dtype)


def _rate_log_prob_kernel(u_ref, x_ref, rate_ref, lp_ref):
    # Single pass: one exp per element, two outputs.
    u = u_ref[...].astype(jnp.float32)
    x = x_ref[...].astype(jnp.float32)
    r = jnp.exp(u)
    rate_ref[...] = r.astype(rate_ref.dtype)
    lp_ref[...] = (u - r * x).astype(lp_ref.dtype)


def _log_prob_bcast_kernel(u_ref, x_ref, lp_ref):
    # u_ref: (1, K) VMEM-resident block (same block every grid step);
    # x_ref / lp_ref: (tile, K).  Broadcast happens in-kernel (sublane bcast).
    u = u_ref[...].astype(jnp.float32)
    x = x_ref[...].astype(jnp.float32)
    lp_ref[...] = (u - jnp.exp(u) * x).astype(lp_ref.dtype)


# ----------------------------- pallas wrappers ------------------------------

def _elementwise_pallas(kernel, inputs, out_dtypes):
    """Tiled elementwise pallas_call over same-shaped inputs.

    Fast path: flattened size % 128 == 0 -> no pad / no slice-back copies.
    Ragged sizes: pad only the tail to the next lane row; ragged last grid
    block is clipped by Pallas (grid = cdiv(rows, tile)).
    """
    shape = inputs[0].shape
    n = inputs[0].size
    sub = max([_min_sublane(a.dtype) for a in inputs]
              + [_min_sublane(d) for d in out_dtypes])

    pad = (-n) % _LANE
    rows = (n + pad) // _LANE
    slabs = []
    for a in inputs:
        flat = a.reshape(-1)
        if pad:
            flat = jnp.pad(flat, (0, pad))     # tail-only pad (< one lane row)
        slabs.append(flat.reshape(rows, _LANE))

    tile = _pick_row_tile(rows, sub)
    grid = (pl.cdiv(rows, tile),)

    def blk():
        return pl.BlockSpec((tile, _LANE), lambda i: (i, 0))

    multi = len(out_dtypes) > 1
    out_shape = tuple(jax.ShapeDtypeStruct((rows, _LANE), d) for d in out_dtypes)
    out_specs = tuple(blk() for _ in out_dtypes)
    if not multi:
        out_shape, out_specs = out_shape[0], out_specs[0]

    outs = pl.pallas_call(
        kernel,
        out_shape=out_shape,
        grid_spec=pl.GridSpec(grid=grid,
                              in_specs=[blk() for _ in inputs],
                              out_specs=out_specs),
        compiler_params=_compiler_params(),
    )(*slabs)

    if not multi:
        outs = (outs,)
    results = []
    for o in outs:
        flat = o.reshape(-1)
        if pad:
            flat = flat[:n]
        results.append(flat.reshape(shape))
    return tuple(results) if multi else results[0]


def _log_prob_broadcast_u(u, x, out_dtype):
    """x.shape = [*lead, *u.shape]: keep u resident in VMEM, tile x over batch.

    HBM traffic scales with |x| only; the replicated u is never materialized.
    """
    K = u.size
    B = x.size // K
    sub = max(_min_sublane(u.dtype), _min_sublane(x.dtype),
              _min_sublane(out_dtype))

    by_vmem = max(sub, (_BCAST_BLOCK_BYTES // max(1, K * 4)) // sub * sub)
    tile = min(B, by_vmem, _TILE_ROWS)
    if B > _MIN_GRID_STEPS * sub:
        tile = min(tile, -(-B // _MIN_GRID_STEPS))
    tile = max(sub, (tile // sub) * sub)
    if tile > B:
        tile = B                                 # block dim == full dim is legal
    grid = (pl.cdiv(B, tile),)

    out = pl.pallas_call(
        _log_prob_bcast_kernel,
        out_shape=jax.ShapeDtypeStruct((B, K), out_dtype),
        grid_spec=pl.GridSpec(
            grid=grid,
            in_specs=[pl.BlockSpec((1, K), lambda i: (0, 0)),      # resident u
                      pl.BlockSpec((tile, K), lambda i: (i, 0))],
            out_specs=pl.BlockSpec((tile, K), lambda i: (i, 0))),
        compiler_params=_compiler_params(),
    )(u.reshape(1, K), x.reshape(B, K))
    return out.reshape(x.shape)


# ------------------------------ public wrappers ------------------------------

def compute_rate(rate_unconstr: jax.Array, out_dtype=None) -> jax.Array:
    if out_dtype is None:
        out_dtype = rate_unconstr.dtype
    if rate_unconstr.size < _PALLAS_MIN_ELEMS:
        # One-vreg-ish problem: launch overhead dominates; let XLA fuse it.
        return jnp.exp(rate_unconstr.astype(jnp.float32)).astype(out_dtype)
    return _elementwise_pallas(_rate_kernel, [rate_unconstr], [out_dtype])


def exponential_log_prob_from_unconstr(rate_unconstr: jax.Array,
                                       x: jax.Array,
                                       out_dtype=None) -> jax.Array:
    u = rate_unconstr
    if out_dtype is None:
        out_dtype = jnp.result_type(u.dtype, x.dtype)
    out_shape = jnp.broadcast_shapes(u.shape, x.shape)
    total = math.prod(out_shape) if out_shape else 1

    if total < _PALLAS_MIN_ELEMS:
        uf = u.astype(jnp.float32)
        return (uf - jnp.exp(uf) * x.astype(jnp.float32)).astype(out_dtype)

    if u.shape == x.shape == out_shape:
        return _elementwise_pallas(_log_prob_kernel, [u, x], [out_dtype])

    if (out_shape == x.shape and u.ndim <= x.ndim
            and x.shape[x.ndim - u.ndim:] == u.shape
            and _LANE <= u.size <= _BCAST_MAX_U_ELEMS):
        return _log_prob_broadcast_u(u, x, out_dtype)

    # TODO(synk): general / tiny-u broadcasting patterns have no clean single
    # kernel tiling here; jnp (XLA) fuses this without materializing u.
    uf = u.astype(jnp.float32)
    return (uf - jnp.exp(uf) * x.astype(jnp.float32)).astype(out_dtype)


def rate_and_log_prob(rate_unconstr: jax.Array, x: jax.Array, out_dtype=None):
    """Fused (rate, log_prob(x)).  `rate` always keeps rate_unconstr's shape."""
    u = rate_unconstr
    if out_dtype is None:
        out_dtype = u.dtype
    lp_dtype = jnp.result_type(out_dtype, x.dtype)
    if u.shape == x.shape and u.size >= _PALLAS_MIN_ELEMS:
        # Single pass over u/x, one exp per element, two outputs.
        return _elementwise_pallas(_rate_log_prob_kernel, [u, x],
                                   [out_dtype, lp_dtype])
    rate = compute_rate(u, out_dtype)
    lp = exponential_log_prob_from_unconstr(u, x, lp_dtype)
    return rate, lp


# --------------------------- module re-implementation ------------------------

class ExponentialDist:
    """Minimal stand-in for torch.distributions.Exponential(rate)."""

    def __init__(self, rate: jax.Array, rate_unconstr: jax.Array = None):
        self.rate = rate
        # log(rate) == rate_unconstr exactly (rate = exp(rate_unconstr)):
        # caching it lets log_prob skip the log transcendental entirely.
        self._log_rate = rate_unconstr

    @property
    def mean(self):
        return 1.0 / self.rate

    def log_prob(self, x: jax.Array):
        # NOTE: support (x >= 0) not validated (matches validate_args=False).
        if self._log_rate is not None:
            return exponential_log_prob_from_unconstr(self._log_rate, x)
        return jnp.log(self.rate) - self.rate * x


class VB_Exponential:
    """JAX/Pallas port of nnTreeVB VB_Exponential (forward semantics)."""

    def __init__(self, in_shape, out_shape, init_params=(10.0,),
                 learn_params=True, transform_dist=None, dtype=jnp.float32):
        self.in_shape = list(in_shape)
        self.out_shape = list(out_shape)
        self.transform_dist = transform_dist
        # TODO(synk): StickBreakingTransform / TransformedDistribution support
        # (would shrink the last dim by 1 and wrap the base distribution).
        self.nb_params = 1
        self.learn_params = learn_params
        self.dtype_ = dtype

        # init_parameters: constant fill of shape [*in_shape, nb_params],
        # take [..., 0], apply inverse positive transform (log).
        init_val = float(init_params[0])
        filled = jnp.full(tuple(self.in_shape) + (self.nb_params,),
                          init_val, dtype=dtype)
        self.rate_unconstr = jnp.log(filled[..., 0])      # shape == in_shape

    def forward(self):
        self.rate = compute_rate(self.rate_unconstr)
        self.dist = ExponentialDist(self.rate, rate_unconstr=self.rate_unconstr)
        return self.dist

    def forward_and_log_prob(self, x: jax.Array):
        """Primary fused path: (rate [in_shape], log_prob(x) [x's shape])."""
        rate, lp = rate_and_log_prob(self.rate_unconstr, x)
        self.rate = rate
        self.dist = ExponentialDist(rate, rate_unconstr=self.rate_unconstr)
        return rate, lp

    __call__ = forward


# ---------------------------------- main -------------------------------------

if __name__ == "__main__":
    key = jax.random.PRNGKey(0)
    k1, k2, k3 = jax.random.split(key, 3)

    # Case 1: lane-aligned parameter -> Pallas elementwise + fused kernels.
    S, H = 1024, 128                        # 512 KiB f32, above jnp-fallback cutoff
    m1 = VB_Exponential(in_shape=[S, H], out_shape=[S, H], init_params=[10.0])
    dist1 = m1.forward()
    rate1 = jax.block_until_ready(dist1.rate)
    ref_rate1 = jnp.exp(m1.rate_unconstr)
    assert rate1.shape == (S, H) and rate1.dtype == jnp.float32
    assert jnp.allclose(rate1, ref_rate1, rtol=1e-6, atol=1e-6)

    x1 = jax.random.uniform(k1, (S, H), jnp.float32, minval=0.01, maxval=1.0)
    r1b, lp1 = m1.forward_and_log_prob(x1)          # fused single-pass kernel
    lp1 = jax.block_until_ready(lp1)
    ref_lp1 = jnp.log(ref_rate1) - ref_rate1 * x1
    assert jnp.allclose(r1b, ref_rate1, rtol=1e-6, atol=1e-6)
    assert jnp.allclose(lp1, ref_lp1, rtol=1e-5, atol=1e-5)

    # Case 2: VI pattern x = [n_samples, *in_shape] -> resident-u kernel,
    # u never replicated in HBM; rate keeps in_shape.
    in2 = (16, 96)
    m2 = VB_Exponential(in_shape=list(in2), out_shape=list(in2), init_params=[2.5])
    dist2 = m2.forward()
    x2 = jax.random.uniform(k2, (48,) + in2, jnp.float32, minval=0.01, maxval=2.0)
    lp2 = jax.block_until_ready(dist2.log_prob(x2))
    ref_rate2 = jnp.exp(m2.rate_unconstr)
    ref_lp2 = jnp.log(ref_rate2) - ref_rate2 * x2
    assert dist2.rate.shape == in2
    assert lp2.shape == x2.shape
    assert jnp.allclose(lp2, ref_lp2, rtol=1e-5, atol=1e-5)

    # Case 3: non-lane-aligned large shape -> tail-only pad + ragged grid.
    in3 = (300, 301)
    m3 = VB_Exponential(in_shape=list(in3), out_shape=list(in3), init_params=[1.3])
    x3 = jax.random.uniform(k3, in3, jnp.float32, minval=0.01, maxval=3.0)
    r3, lp3 = m3.forward_and_log_prob(x3)
    r3 = jax.block_until_ready(r3)
    lp3 = jax.block_until_ready(lp3)
    ref_r3 = jnp.exp(m3.rate_unconstr)
    assert r3.shape == in3 and lp3.shape == in3
    assert jnp.allclose(r3, ref_r3, rtol=1e-6, atol=1e-6)
    assert jnp.allclose(lp3, jnp.log(ref_r3) - ref_r3 * x3, rtol=1e-5, atol=1e-5)

    # Case 4: tiny parameter -> plain-jnp fast fallback (launch overhead skip).
    m4 = VB_Exponential(in_shape=[3, 7, 19], out_shape=[3, 7, 19], init_params=[10.0])
    d4 = m4.forward()
    x4 = jax.random.uniform(key, (3, 7, 19), jnp.float32, minval=0.01, maxval=1.0)
    lp4 = jax.block_until_ready(d4.log_prob(x4))
    ref_r4 = jnp.exp(m4.rate_unconstr)
    assert jnp.allclose(lp4, jnp.log(ref_r4) - ref_r4 * x4, rtol=1e-5, atol=1e-5)

    print("KERNEL_OK")
</pallas_src>

<mosaic_0001>
module attributes {stable_mosaic.version = 11 : i64} {
  func.func @_rate_kernel(%arg0: i32, %arg1: memref<256x128xf32, #tpu.memory_space<vmem>>, %arg2: memref<256x128xf32, #tpu.memory_space<vmem>>) attributes {dimension_semantics = [#tpu.dimension_semantics<parallel>], iteration_bounds = array<i64: 4>, scalar_prefetch = 0 : i64, scratch_operands = 0 : i64, tpu.core_type = #tpu.core_type<tc>, window_params = [{transform_indices = @transform_0, window_bounds = array<i64: 256, 128>}, {transform_indices = @transform_1, window_bounds = array<i64: 256, 128>}]} {
    %c0 = arith.constant 0 : index
    %c0_0 = arith.constant 0 : index
    %0 = vector.load %arg1[%c0, %c0_0] : memref<256x128xf32, #tpu.memory_space<vmem>>, vector<256x128xf32>
    %1 = math.exp %0 : vector<256x128xf32>
    %c0_1 = arith.constant 0 : index
    %c0_2 = arith.constant 0 : index
    %2 = vector.load %arg2[%c0_1, %c0_2] : memref<256x128xf32, #tpu.memory_space<vmem>>, vector<256x128xf32>
    tpu.vector_store %arg2[%c0_1, %c0_2], %1 {strides = array<i32>} : memref<256x128xf32, #tpu.memory_space<vmem>>, vector<256x128xf32>,
    return
  }
  func.func @transform_0(%arg0: i32) -> (i32, i32) {
    %c0_i32 = arith.constant 0 : i32
    %c0_i32_0 = arith.constant 0 : i32
    return %arg0, %c0_i32 : i32, i32
  }
  func.func @transform_1(%arg0: i32) -> (i32, i32) {
    %c0_i32 = arith.constant 0 : i32
    %c0_i32_0 = arith.constant 0 : i32
    return %arg0, %c0_i32 : i32, i32
  }
}

</mosaic_0001>

<bundles_post_ra>
// kernel: tpu_custom_call.1
= control target key start
LH: loop header
LB: loop body
LE: loop exit
PB: predicated region body
PF: predicated region fallthrough
CT: control target
= control target key end

     0   :  { %6 = vsyncpa [#allocation3], 0  ;;  %s817_s0 = inlined_call_operand.hbm [shape: f32[1024,128], index: 0, kind: input, shape index: {}]   ;;  %s818_s1 = inlined_call_operand.hbm [shape: f32[1024,128], index: 1, kind: output, shape index: {}]  }
   0x1   :  { %8 = vsyncpa [#allocation3 + $0x1], 0 }
   0x2   :  { %9 = vsyncpa [#allocation4], 0 }
   0x3   :  { %11 = vsyncpa [#allocation4 + $0x1], 0  ;;  %s592_s6 = smov 0   ;;  %s594_s7 = smov 0  }
   0x4   :  { %s596_s8 = smov 0   ;;  %s598_s9 = smov 0  }
   0x5 LB: > { %s613_s10 = sadd.s32 4294967295, %s574_s9   ;;  %s352_s11 = sadd.s32 4294967294, %s574_s9   ;;  %s574_s9 = sphi %s598_s9, %s832_s9   ;;  %s570_s8 = sphi %s596_s8, %s831_s8   ;;  %s566_s7 = sphi %s594_s7, %s830_s7   ;;  %s562_s6 = sphi %s592_s6, %s829_s6  }
   0x6   : > { %s617_s12 = sadd.s32 1, %s574_s9   ;;  %s24_s13 = sadd.s32 1, %s570_s8 }
   0x7   : > { %s21_s14 = ssub.s32 %s574_s9, %s617_s12  ;;  %p31_p0 = scmp.ne.s32.totalorder %s570_s8, %s566_s7 }
   0x8   : > { %p22_p1 = scmp.eq.s32.totalorder %s21_s14, 0  ;;  %p32_p2 = scmp.eq.s32.totalorder %s574_s9, 0 }
   0x9   : > { %p37_p3 = scmp.ne.s32.totalorder %s566_s7, %s562_s6  ;;  %p38_p4 = scmp.eq.s32.totalorder %s613_s10, 0 }
   0xa   : > { %s629_s15 = scalar_select %p22_p1, %s570_s8, %s24_s13  }
   0xb   : > { %p631_p5 = por %p32_p2, %p31_p0  ;;  %p635_p6 = por %p38_p4, %p37_p3 }
   0xc   : > { %p61_p7 = scmp.eq.s32.totalorder %s613_s10, 3  ;;  %p67_p8 = scmp.eq.s32.totalorder %s352_s11, 3 }
   0xd   : > { %s822_s17 = scalar_select %p635_p6, 1, 0 }
   0xe   : > { %p380_p9 = scmp.lt.s32.totalorder %s574_s9, 4  ;;  %p641_p10 = por %p61_p7, %p31_p0 }
   0xf   : > { %p645_p11 = por %p67_p8, %p37_p3  ;;  %s87_s20 = sand.u32 1, %s570_s8  }
  0x10   : > { %s823_s18 = scalar_select %p641_p10, 1, 0 }
  0x11   : > { %s824_s19 = scalar_select %p645_p11, 1, 0 }
  0x12   : > { %s366_s21 = sshll.u32 %s574_s9, 12  ;;  %s355_s22 = sshll.u32 %s87_s20, 8 }
  0x13   : > { %s654_s25 = scalar_lea.hbm %s817_s0, %s366_s21  ;;  %s91_s26 = scalar_lea.vmem [#allocation2], %s355_s22 }
  0x14   : > { %s98_s27 = sshll.u32 %s91_s26, 4  ;;  %p658_p12 = pnand %p380_p9, %p631_p5  ;;  %s662_s27 = int_to_ptr.vmem [resolvable:$true] %s98_s27 }
  0x15   : > { %s664_s29 = scalar_lea.sflag [#allocation3], %s87_s20  ;;  %s482_s30 = scalar_lea.hbm %s654_s25, 4096 }
  0x16   : > { %p483_p13 = scmp.ne.s32.totalorder %s654_s25, %s482_s30  ;;  %p484_p0 = pneg %p658_p12 }
  0x17   : > { %s487_s4 = scalar_lea.hbm %s817_s0, 16384  ;;  %p488_p3 = scmp.lt.s32.totalorder %s654_s25, %s817_s0 }
  0x18   : > { %p485_p1 = pnand %p484_p0, %p483_p13  ;;  %p489_p4 = scmp.lt.s32.totalorder %s487_s4, %s482_s30 }
  0x1a   : > { %p486_p2 = pneg %p485_p1  ;;  %p490_p5 = por %p489_p4, %p488_p3 }
  0x1c   : > { %p491_p7 = pnand %p490_p5, %p486_p2 }
  0x1e   : > { %494 = shalt.err (!%p491_p7)
}
  0x1f   : > { %s495_s13 = scalar_lea.vmem %s662_s27, 4096  ;;  %s576_s14 = smov [#allocation2]  }
  0x20   : > { %p496_p8 = scmp.ne.s32.totalorder %s662_s27, %s495_s13  ;;  %s500_s16 = sshll.u32 %s576_s14, 4  ;;  %s501_s16 = int_to_ptr.vmem [resolvable:$false] %s500_s16 }
  0x21   : > { %s502_s20 = scalar_lea.vmem %s501_s16, 8192  ;;  %p503_p1 = scmp.lt.s32.totalorder %s662_s27, %s501_s16 }
  0x22   : > { %p498_p9 = pnand %p496_p8, %p484_p0  ;;  %p504_p11 = scmp.lt.s32.totalorder %s502_s20, %s495_s13 }
  0x24   : > { %p499_p13 = pneg %p498_p9  ;;  %p505_p10 = por %p504_p11, %p503_p1 }
  0x26   : > { %p506_p6 = pnand %p505_p10, %p499_p13 }
  0x28   : > { %509 = shalt.err (!%p506_p6)
}
  0x29   : > { %s577_s21 = smov 128   ;;  %s578_s22 = smov 8  }
  0x2a   : > { %375 = dma.hbm_to_vmem [thread:$0]  (!%p658_p12), %s654_s25, 4096, %s662_s27, %s664_s29, %s577_s21, %s577_s21, %s578_s22  }
  0x2b   : > { %p358_p0 = scmp.ge.s32.totalorder %s574_s9, 1  ;;  %p106_p2 = scmp.lt.s32.totalorder %s574_s9, 5 }
  0x2d   : > { %p107_p3 = pnand %p358_p0, %p106_p2 }
  0x2e   : > { %s688_s23 = sand.u32 (!%p107_p3), 1, %s566_s7   ;;  %p826_p6 = scmp.ne.s32.totalorder (!%p107_p3), %s822_s17, 0 }
  0x2f   : > { %110 = sbr.rel (%p107_p3) target bundleno = 115 (0x73), region = 24  ;;  %s359_s24 = sshll.u32 (!%p107_p3), %s688_s23, 8 }
  0x30   : > { %s113_s26 = scalar_lea.sflag (!%p107_p3), [#allocation3], %s688_s23  ;;  %s694_s30 = scalar_lea.vmem (!%p107_p3), [#allocation2], %s359_s24 }
  0x34   : > { %553 = dma.done.wait (%p826_p6), %s113_s26, 4096  }
  0x35   : > { %555 = vsyncadd (%p826_p6), %s113_s26, 4294963200  ;;  %v137_v0 = vld [vmem:[%s694_s30] sm:$0xff]  ;;  %v138_v1 = vld [vmem:[%s694_s30 + $0x8] sm:$0xff]  ;;  %s723_s17 = scalar_lea.vmem [#allocation5], %s359_s24  ;;  %s367_s25 = sshll.u32 %s613_s10, 12 }
  0x36   : > { %v139_v2 = vld [vmem:[%s694_s30 + $0x10] sm:$0xff]  ;;  %v169_v3 = vmul.f32 1.442695, %v137_v0  ;;  %v171_v4 = vmul.f32 1.442695, %v138_v1  ;;  %v140_v6 = vld [vmem:[%s694_s30 + $0x18] sm:$0xff]  ;;  %s770_s2 = scalar_lea.hbm %s818_s1, %s367_s25 }
  0x37   : > { %v173_v5 = vmul.f32 1.442695, %v139_v2  ;;  %v141_v7 = vld [vmem:[%s694_s30 + $0x20] sm:$0xff]  ;;  %v142_v8 = vld [vmem:[%s694_s30 + $0x28] sm:$0xff]  ;;  %v175_v9 = vmul.f32 1.442695, %v140_v6 }
  0x38   : > { %418 = vpow2.f32 %v169_v3  ;;  %v177_v10 = vmul.f32 1.442695, %v141_v7  ;;  %v179_v11 = vmul.f32 1.442695, %v142_v8  ;;  %v143_v12 = vld [vmem:[%s694_s30 + $0x30] sm:$0xff]  ;;  %v144_v13 = vld [vmem:[%s694_s30 + $0x38] sm:$0xff] }
  0x39   : > { %420 = vpow2.f32 %v171_v4  ;;  %v145_v14 = vld [vmem:[%s694_s30 + $0x40] sm:$0xff]  ;;  %v181_v15 = vmul.f32 1.442695, %v143_v12  ;;  %v183_v16 = vmul.f32 1.442695, %v144_v13  ;;  %v146_v17 = vld [vmem:[%s694_s30 + $0x48] sm:$0xff] }
  0x3a   : > { %422 = vpow2.f32 %v173_v5  ;;  %v147_v18 = vld [vmem:[%s694_s30 + $0x50] sm:$0xff]  ;;  %v185_v19 = vmul.f32 1.442695, %v145_v14  ;;  %v148_v20 = vld [vmem:[%s694_s30 + $0x58] sm:$0xff]  ;;  %v187_v21 = vmul.f32 1.442695, %v146_v17 }
  0x3b   : > { %424 = vpow2.f32 %v175_v9  ;;  %v149_v22 = vld [vmem:[%s694_s30 + $0x60] sm:$0xff]  ;;  %v189_v23 = vmul.f32 1.442695, %v147_v18  ;;  %v150_v24 = vld [vmem:[%s694_s30 + $0x68] sm:$0xff]  ;;  %v191_v25 = vmul.f32 1.442695, %v148_v20 }
  0x3c   : > { %426 = vpow2.f32 %v177_v10  ;;  %v151_v26 = vld [vmem:[%s694_s30 + $0x70] sm:$0xff]  ;;  %v193_v27 = vmul.f32 1.442695, %v149_v22  ;;  %v152_v28 = vld [vmem:[%s694_s30 + $0x78] sm:$0xff]  ;;  %v195_v29 = vmul.f32 1.442695, %v150_v24 }
  0x3d   : > { %428 = vpow2.f32 %v179_v11  ;;  %v153_v30 = vld [vmem:[%s694_s30 + $0x80] sm:$0xff]  ;;  %v197_v31 = vmul.f32 1.442695, %v151_v26  ;;  %v154_v32 = vld [vmem:[%s694_s30 + $0x88] sm:$0xff]  ;;  %v199_v33 = vmul.f32 1.442695, %v152_v28 }
  0x3e   : > { %430 = vpow2.f32 %v181_v15  ;;  %v155_v34 = vld [vmem:[%s694_s30 + $0x90] sm:$0xff]  ;;  %v201_v35 = vmul.f32 1.442695, %v153_v30  ;;  %v156_v36 = vld [vmem:[%s694_s30 + $0x98] sm:$0xff]  ;;  %v203_v38 = vmul.f32 1.442695, %v154_v32 }
  0x3f   : > { %432 = vpow2.f32 %v183_v16  ;;  %v157_v39 = vld [vmem:[%s694_s30 + $0xa0] sm:$0xff]  ;;  %v205_v41 = vmul.f32 1.442695, %v155_v34  ;;  %v158_v42 = vld [vmem:[%s694_s30 + $0xa8] sm:$0xff]  ;;  %v207_v44 = vmul.f32 1.442695, %v156_v36 }
  0x40   : > { %434 = vpow2.f32 %v185_v19  ;;  %v159_v45 = vld [vmem:[%s694_s30 + $0xb0] sm:$0xff]  ;;  %v209_v47 = vmul.f32 1.442695, %v157_v39  ;;  %v160_v48 = vld [vmem:[%s694_s30 + $0xb8] sm:$0xff]  ;;  %v211_v50 = vmul.f32 1.442695, %v158_v42 }
  0x41   : > { %436 = vpow2.f32 %v187_v21  ;;  %v161_v51 = vld [vmem:[%s694_s30 + $0xc0] sm:$0xff]  ;;  %v213_v53 = vmul.f32 1.442695, %v159_v45  ;;  %v162_v54 = vld [vmem:[%s694_s30 + $0xc8] sm:$0xff]  ;;  %v215_v56 = vmul.f32 1.442695, %v160_v48 }
  0x42   : > { %438 = vpow2.f32 %v189_v23  ;;  %v163_v57 = vld [vmem:[%s694_s30 + $0xd0] sm:$0xff]  ;;  %v217_v59 = vmul.f32 1.442695, %v161_v51  ;;  %v164_v60 = vld [vmem:[%s694_s30 + $0xd8] sm:$0xff]  ;;  %v219_v62 = vmul.f32 1.442695, %v162_v54 }
  0x43   : > { %440 = vpow2.f32 %v191_v25  ;;  %v165_v63 = vld [vmem:[%s694_s30 + $0xe0] sm:$0xff]  ;;  %v221_v1 = vmul.f32 1.442695, %v163_v57  ;;  %v166_v2 = vld [vmem:[%s694_s30 + $0xe8] sm:$0xff]  ;;  %v223_v4 = vmul.f32 1.442695, %v164_v60 }
  0x44   : > { %442 = vpow2.f32 %v193_v27  ;;  %v167_v5 = vld [vmem:[%s694_s30 + $0xf0] sm:$0xff]  ;;  %v225_v7 = vmul.f32 1.442695, %v165_v63  ;;  %v168_v8 = vld [vmem:[%s694_s30 + $0xf8] sm:$0xff]  ;;  %v227_v10 = vmul.f32 1.442695, %v166_v2 }
  0x45   : > { %v419_v37 = vpop.eup %418  ;;  %444 = vpow2.f32 %v195_v29  ;;  %v229_v12 = vmul.f32 1.442695, %v167_v5  ;;  %v231_v14 = vmul.f32 1.442695, %v168_v8  ;;  %s279_s27 = sshll.u32 %s723_s17, 4  ;;  %s266_s10 = scalar_lea.sflag [#allocation4], %s688_s23  ;;  %s772_s27 = int_to_ptr.vmem [resolvable:$true] %s279_s27 }
  0x46   : > { %v421_v40 = vpop.eup %420  ;;  %233 = vst [vmem:[%s723_s17] sm:$0xff] %v419_v37  ;;  %446 = vpow2.f32 %v197_v31  ;;  %s510_s3 = scalar_lea.vmem %s772_s27, 4096  ;;  %p827_p11 = scmp.ne.s32.totalorder %s823_s18, 0 }
  0x47   : > { %v423_v43 = vpop.eup %422  ;;  %234 = vst [vmem:[%s723_s17 + $0x8] sm:$0xff] %v421_v40  ;;  %448 = vpow2.f32 %v199_v33  ;;  %p511_p10 = scmp.ne.s32.totalorder %s772_s27, %s510_s3  ;;  %s579_s4 = smov [#allocation5]  }
  0x48   : > { %v425_v46 = vpop.eup %424  ;;  %235 = vst [vmem:[%s723_s17 + $0x10] sm:$0xff] %v423_v43  ;;  %450 = vpow2.f32 %v201_v35  ;;  %s514_s5 = sshll.u32 %s579_s4, 4  ;;  %s515_s5 = int_to_ptr.vmem [resolvable:$false] %s514_s5 }
  0x49   : > { %v427_v49 = vpop.eup %426  ;;  %236 = vst [vmem:[%s723_s17 + $0x18] sm:$0xff] %v425_v46  ;;  %452 = vpow2.f32 %v203_v38  ;;  %p512_p12 = pnand %p511_p10, %p827_p11  ;;  %s516_s11 = scalar_lea.vmem %s515_s5, 8192 }
  0x4a   : > { %v429_v52 = vpop.eup %428  ;;  %237 = vst [vmem:[%s723_s17 + $0x20] sm:$0xff] %v427_v49  ;;  %454 = vpow2.f32 %v205_v41  ;;  %p517_p5 = scmp.lt.s32.totalorder %s772_s27, %s515_s5  ;;  %p518_p7 = scmp.lt.s32.totalorder %s516_s11, %s510_s3 }
  0x4b   : > { %v431_v55 = vpop.eup %430  ;;  %238 = vst [vmem:[%s723_s17 + $0x28] sm:$0xff] %v429_v52  ;;  %456 = vpow2.f32 %v207_v44  ;;  %p513_p4 = pneg %p512_p12 }
  0x4c   : > { %v433_v58 = vpop.eup %432  ;;  %239 = vst [vmem:[%s723_s17 + $0x30] sm:$0xff] %v431_v55  ;;  %458 = vpow2.f32 %v209_v47  ;;  %p519_p8 = por %p518_p7, %p517_p5 }
  0x4d   : > { %v435_v61 = vpop.eup %434  ;;  %240 = vst [vmem:[%s723_s17 + $0x38] sm:$0xff] %v433_v58  ;;  %460 = vpow2.f32 %v211_v50 }
  0x4e   : > { %v437_v0 = vpop.eup %436  ;;  %241 = vst [vmem:[%s723_s17 + $0x40] sm:$0xff] %v435_v61  ;;  %462 = vpow2.f32 %v213_v53  ;;  %p520_p9 = pnand %p519_p8, %p513_p4 }
  0x4f   : > { %v439_v3 = vpop.eup %438  ;;  %242 = vst [vmem:[%s723_s17 + $0x48] sm:$0xff] %v437_v0  ;;  %464 = vpow2.f32 %v215_v56 }
  0x50   : > { %v441_v6 = vpop.eup %440  ;;  %243 = vst [vmem:[%s723_s17 + $0x50] sm:$0xff] %v439_v3  ;;  %466 = vpow2.f32 %v217_v59 }
  0x51   : > { %v443_v9 = vpop.eup %442  ;;  %244 = vst [vmem:[%s723_s17 + $0x58] sm:$0xff] %v441_v6  ;;  %468 = vpow2.f32 %v219_v62 }
  0x52   : > { %v445_v11 = vpop.eup %444  ;;  %245 = vst [vmem:[%s723_s17 + $0x60] sm:$0xff] %v443_v9  ;;  %470 = vpow2.f32 %v221_v1 }
  0x53   : > { %v447_v13 = vpop.eup %446  ;;  %246 = vst [vmem:[%s723_s17 + $0x68] sm:$0xff] %v445_v11  ;;  %472 = vpow2.f32 %v223_v4 }
  0x54   : > { %v449_v15 = vpop.eup %448  ;;  %247 = vst [vmem:[%s723_s17 + $0x70] sm:$0xff] %v447_v13  ;;  %474 = vpow2.f32 %v225_v7 }
  0x55   : > { %v451_v16 = vpop.eup %450  ;;  %248 = vst [vmem:[%s723_s17 + $0x78] sm:$0xff] %v449_v15  ;;  %476 = vpow2.f32 %v227_v10 }
  0x56   : > { %v453_v17 = vpop.eup %452  ;;  %249 = vst [vmem:[%s723_s17 + $0x80] sm:$0xff] %v451_v16  ;;  %478 = vpow2.f32 %v229_v12 }
  0x57   : > { %v455_v18 = vpop.eup %454  ;;  %250 = vst [vmem:[%s723_s17 + $0x88] sm:$0xff] %v453_v17  ;;  %480 = vpow2.f32 %v231_v14 }
  0x58   : > { %v457_v19 = vpop.eup %456  ;;  %251 = vst [vmem:[%s723_s17 + $0x90] sm:$0xff] %v455_v18 }
  0x59   : > { %v459_v20 = vpop.eup %458  ;;  %252 = vst [vmem:[%s723_s17 + $0x98] sm:$0xff] %v457_v19 }
  0x5a   : > { %v461_v21 = vpop.eup %460  ;;  %253 = vst [vmem:[%s723_s17 + $0xa0] sm:$0xff] %v459_v20 }
  0x5b   : > { %v463_v22 = vpop.eup %462  ;;  %254 = vst [vmem:[%s723_s17 + $0xa8] sm:$0xff] %v461_v21 }
  0x5c   : > { %v465_v23 = vpop.eup %464  ;;  %255 = vst [vmem:[%s723_s17 + $0xb0] sm:$0xff] %v463_v22 }
  0x5d   : > { %v467_v24 = vpop.eup %466  ;;  %256 = vst [vmem:[%s723_s17 + $0xb8] sm:$0xff] %v465_v23 }
  0x5e   : > { %v469_v25 = vpop.eup %468  ;;  %257 = vst [vmem:[%s723_s17 + $0xc0] sm:$0xff] %v467_v24 }
  0x5f   : > { %v471_v26 = vpop.eup %470  ;;  %258 = vst [vmem:[%s723_s17 + $0xc8] sm:$0xff] %v469_v25 }
  0x60   : > { %v473_v27 = vpop.eup %472  ;;  %259 = vst [vmem:[%s723_s17 + $0xd0] sm:$0xff] %v471_v26 }
  0x61   : > { %v475_v28 = vpop.eup %474  ;;  %260 = vst [vmem:[%s723_s17 + $0xd8] sm:$0xff] %v473_v27 }
  0x62   : > { %v477_v29 = vpop.eup %476  ;;  %261 = vst [vmem:[%s723_s17 + $0xe0] sm:$0xff] %v475_v28 }
  0x63   : > { %v479_v30 = vpop.eup %478  ;;  %262 = vst [vmem:[%s723_s17 + $0xe8] sm:$0xff] %v477_v29 }
  0x64   : > { %v481_v31 = vpop.eup %480  ;;  %263 = vst [vmem:[%s723_s17 + $0xf0] sm:$0xff] %v479_v30 }
  0x65   : > { %264 = vst [vmem:[%s723_s17 + $0xf8] sm:$0xff] %v481_v31 }
  0x66   : > { %523 = shalt.err (!%p520_p9)
}
  0x67   : > { %s524_s13 = scalar_lea.hbm %s770_s2, 4096  ;;  %s528_s20 = scalar_lea.hbm %s818_s1, 16384 }
  0x68   : > { %p525_p13 = scmp.ne.s32.totalorder %s770_s2, %s524_s13  ;;  %p529_p2 = scmp.lt.s32.totalorder %s770_s2, %s818_s1 }
  0x69   : > { %p530_p3 = scmp.lt.s32.totalorder %s528_s20, %s524_s13 }
  0x6a   : > { %p526_p1 = pnand %p525_p13, %p827_p11 }
  0x6b   : > { %p531_p6 = por %p530_p3, %p529_p2 }
  0x6c   : > { %p527_p0 = pneg %p526_p1 }
  0x6e   : > { %p532_p10 = pnand %p531_p6, %p527_p0 }
  0x70   : > { %535 = shalt.err (!%p532_p10)
}
  0x71   : > { %s580_s24 = smov 128   ;;  %s581_s26 = smov 8  }
  0x72   : > { %370 = dma.vmem_to_hbm [thread:$0]  (%p827_p11), %s772_s27, 4096, %s770_s2, %s266_s10, %s580_s24, %s580_s24, %s581_s26  }
  0x73 PF: > { %p381_p12 = scmp.ge.s32.totalorder %s574_s9, 2  ;;  %s294_s30 = sand.u32 1, %s562_s6  }
  0x74   : > { %p828_p4 = scmp.ne.s32.totalorder %s824_s19, 0  ;;  %s295_s17 = scalar_lea.sflag [#allocation4], %s294_s30 }
  0x76   : > { %p377_p5 = pnand %p381_p12, %p828_p4 }
  0x78   : > { %p378_p7 = pneg %p377_p5 }
  0x7a   : > { %557 = dma.done.wait (%p378_p7), %s295_s17, 4096  }
  0x7b   : > { %559 = vsyncadd (%p378_p7), %s295_s17, 4294963200  ;;  %p14_p8 = scmp.ge.s32.totalorder %s617_s12, 6   ;;  %s829_s6 = smov %s566_s7 }
  0x7c   : > { %s830_s7 = smov %s570_s8  ;;  %s831_s8 = smov %s629_s15 }
  0x7d   : > { %s832_s9 = smov %s617_s12  ;;  %16 = sbr.rel (!%p14_p8) target bundleno = 5 (0x5), region = 69 }
  0x82   :  { %300 = vsyncpa [#allocation3], 1 }
  0x83   :  { %302 = vsyncpa [#allocation3 + $0x1], 1 }
  0x84   :  { %303 = vsyncpa [#allocation4], 1 }
  0x85   :  { %305 = vsyncpa [#allocation4 + $0x1], 1 }

</bundles_post_ra>
